<compile_context>
chip_gen: v6e
topology: v6e:2x2x1
jax: 0.10.0
libtpu: 0.0.40
codegen_flags: <defaults>
</compile_context>

<pallas_src>
import functools

import jax
import jax.numpy as jnp
from jax.experimental import pallas as pl
from jax.experimental.pallas import tpu as pltpu


def _round_up(n, m):
    return ((n + m - 1) // m) * m


def _device_kind():
    try:
        return jax.devices()[0].device_kind.lower()
    except Exception:
        return ""


def _use_bf16_act():
    # v6e / v7x have a bf16 VPU/EUP path; v5e (and older) do not.
    kind = _device_kind()
    return ("v6" in kind) or ("v7" in kind)


def _mlp_kernel(x_ref, *refs, act_dtype):
    """Fused forward pass of the whole MLP for one batch tile.

    refs = (w0, b0, w1, b1, ..., wL, bL, out_ref).  x / weights are bf16
    (MXU-native); dots accumulate in f32; bias-add + tanh run in `act_dtype`
    (bf16 on v6e/v7x, f32 on v5e); activations are re-packed to bf16 between
    layers.  Dropout(p=0.0) is the identity and is elided; layer_norm=False.
    """
    out_ref = refs[-1]
    wb = refs[:-1]
    n_layers = len(wb) // 2

    h = x_ref[...]                                    # bf16 [TB, in_dim]
    for li in range(n_layers - 1):
        w_ref, b_ref = wb[2 * li], wb[2 * li + 1]
        acc = jnp.dot(h, w_ref[...], preferred_element_type=jnp.float32)
        h = jnp.tanh((acc + b_ref[...]).astype(act_dtype)).astype(jnp.bfloat16)

    w_ref, b_ref = wb[-2], wb[-1]
    out = jnp.dot(h, w_ref[...], preferred_element_type=jnp.float32) + b_ref[...]
    out_ref[...] = out.astype(out_ref.dtype)          # f32 [TB, out_dim], narrow write


@functools.partial(jax.jit, static_argnames=("block_b",))
def regression_net_forward(x, params, block_b=8192):
    """x: [B, input_size] float32. params: list of (W_t [in,out], b [1,out])."""
    B, in_dim = x.shape
    out_dim = params[-1][0].shape[1]
    n_layers = len(params)
    hidden_dim = params[0][0].shape[1]

    # ---- even-split batch tiling (sublane-aligned); worst-case pad is 7 rows.
    n_blocks = max(1, pl.cdiv(B, block_b))
    TB = _round_up(pl.cdiv(B, n_blocks), 8)
    Bp = TB * n_blocks

    x_p = x if Bp == B else jnp.pad(x, ((0, Bp - B), (0, 0)))
    x_p = x_p.astype(jnp.bfloat16)

    # ---- params: weights -> bf16, biases f32; constant index_map => VMEM-resident.
    flat, wb_specs = [], []
    for (w, b) in params:
        w = w.astype(jnp.bfloat16)
        b = b.astype(jnp.float32)
        flat.extend([w, b])
        wb_specs.append(pl.BlockSpec(w.shape, lambda i: (0, 0)))
        wb_specs.append(pl.BlockSpec(b.shape, lambda i: (0, 0)))

    in_specs = [pl.BlockSpec((TB, in_dim), lambda i: (i, 0))] + wb_specs
    out_specs = pl.BlockSpec((TB, out_dim), lambda i: (i, 0))

    kind = _device_kind()
    act_dtype = jnp.bfloat16 if _use_bf16_act() else jnp.float32

    if "v7" in kind and n_blocks >= 2 and n_blocks % 2 == 0:
        # Shard batch tiles across the two v7x TensorCores.
        dim_sem = (pltpu.CORE_PARALLEL,)
    else:
        dim_sem = ("parallel",)

    # ---- advisory cost estimate for the XLA scheduler.
    flops = 2 * Bp * (in_dim * hidden_dim
                      + (n_layers - 2) * hidden_dim * hidden_dim
                      + hidden_dim * out_dim)
    transcendentals = Bp * (n_layers - 1) * hidden_dim
    param_bytes = sum(int(w.size) * 2 + int(b.size) * 4 for w, b in params)
    bytes_accessed = Bp * in_dim * 2 + Bp * out_dim * 4 + param_bytes

    out = pl.pallas_call(
        functools.partial(_mlp_kernel, act_dtype=act_dtype),
        out_shape=jax.ShapeDtypeStruct((Bp, out_dim), jnp.float32),
        grid=(n_blocks,),
        in_specs=in_specs,
        out_specs=out_specs,
        compiler_params=pltpu.CompilerParams(dimension_semantics=dim_sem),
        cost_estimate=pl.CostEstimate(
            flops=int(flops),
            transcendentals=int(transcendentals),
            bytes_accessed=int(bytes_accessed)),
    )(x_p, *flat)

    # Only strip batch padding (a tiny row slice); no lane padding to strip.
    return out if Bp == B else out[:B]


def init_params(key, input_size, output_size, hidden_dim=40, num_hidden=4):
    """Deterministic synthetic init mirroring nn.Linear default U[-1/sqrt(fan_in), ..]."""
    sizes = [input_size] + [hidden_dim] * num_hidden + [output_size]
    params = []
    for i in range(len(sizes) - 1):
        fan_in, fan_out = sizes[i], sizes[i + 1]
        key, kw, kb = jax.random.split(key, 3)
        bound = 1.0 / jnp.sqrt(jnp.float32(fan_in))
        # Stored transposed: [in_features, out_features] so the kernel does x @ W.
        w_t = jax.random.uniform(kw, (fan_in, fan_out), jnp.float32, -bound, bound)
        b = jax.random.uniform(kb, (1, fan_out), jnp.float32, -bound, bound)
        params.append((w_t, b))
    return params


def reference_forward(x, params, use_bf16_act):
    """Pure-JAX reference replicating the kernel's bf16 rounding points."""
    h = x.astype(jnp.bfloat16).astype(jnp.float32)
    n = len(params)
    for i, (w, b) in enumerate(params):
        h = h @ w.astype(jnp.bfloat16).astype(jnp.float32) + b.astype(jnp.float32)
        if i < n - 1:
            if use_bf16_act:
                h = jnp.tanh(h.astype(jnp.bfloat16))
            else:
                h = jnp.tanh(h)
            h = h.astype(jnp.bfloat16).astype(jnp.float32)
    return h


if __name__ == "__main__":
    # Small shapes consistent with the module: input_shape=(16,), output_size=4, batch=2.
    batch, input_size, output_size = 2, 16, 4
    hidden_dim, num_hidden = 40, 4

    key = jax.random.PRNGKey(0)
    key, kx = jax.random.split(key)
    x = jax.random.normal(kx, (batch, input_size), dtype=jnp.float32)

    params = init_params(key, input_size, output_size,
                         hidden_dim=hidden_dim, num_hidden=num_hidden)

    out = regression_net_forward(x, params)
    out = jax.block_until_ready(out)

    ref = reference_forward(x, params, _use_bf16_act())
    assert out.shape == (batch, output_size), out.shape
    assert jnp.allclose(out, ref, atol=2e-2, rtol=2e-2), (out, ref)

    print("KERNEL_OK")
</pallas_src>

<mosaic_0001>
module attributes {stable_mosaic.version = 11 : i64} {
  func.func @_mlp_kernel(%arg0: i32, %arg1: memref<8x16xbf16, #tpu.memory_space<vmem>>, %arg2: memref<16x40xbf16, #tpu.memory_space<vmem>>, %arg3: memref<1x40xf32, #tpu.memory_space<vmem>>, %arg4: memref<40x40xbf16, #tpu.memory_space<vmem>>, %arg5: memref<1x40xf32, #tpu.memory_space<vmem>>, %arg6: memref<40x40xbf16, #tpu.memory_space<vmem>>, %arg7: memref<1x40xf32, #tpu.memory_space<vmem>>, %arg8: memref<40x40xbf16, #tpu.memory_space<vmem>>, %arg9: memref<1x40xf32, #tpu.memory_space<vmem>>, %arg10: memref<40x4xbf16, #tpu.memory_space<vmem>>, %arg11: memref<1x4xf32, #tpu.memory_space<vmem>>, %arg12: memref<8x4xf32, #tpu.memory_space<vmem>>) attributes {dimension_semantics = [#tpu.dimension_semantics<parallel>], iteration_bounds = array<i64: 1>, scalar_prefetch = 0 : i64, scratch_operands = 0 : i64, tpu.core_type = #tpu.core_type<tc>, window_params = [{transform_indices = @transform_0, window_bounds = array<i64: 8, 16>}, {pipeline_mode = #tpu.pipeline_mode<synchronous>, transform_indices = @transform_1, window_bounds = array<i64: 16, 40>}, {pipeline_mode = #tpu.pipeline_mode<synchronous>, transform_indices = @transform_2, window_bounds = array<i64: 1, 40>}, {pipeline_mode = #tpu.pipeline_mode<synchronous>, transform_indices = @transform_3, window_bounds = array<i64: 40, 40>}, {pipeline_mode = #tpu.pipeline_mode<synchronous>, transform_indices = @transform_4, window_bounds = array<i64: 1, 40>}, {pipeline_mode = #tpu.pipeline_mode<synchronous>, transform_indices = @transform_5, window_bounds = array<i64: 40, 40>}, {pipeline_mode = #tpu.pipeline_mode<synchronous>, transform_indices = @transform_6, window_bounds = array<i64: 1, 40>}, {pipeline_mode = #tpu.pipeline_mode<synchronous>, transform_indices = @transform_7, window_bounds = array<i64: 40, 40>}, {pipeline_mode = #tpu.pipeline_mode<synchronous>, transform_indices = @transform_8, window_bounds = array<i64: 1, 40>}, {pipeline_mode = #tpu.pipeline_mode<synchronous>, transform_indices = @transform_9, window_bounds = array<i64: 40, 4>}, {pipeline_mode = #tpu.pipeline_mode<synchronous>, transform_indices = @transform_10, window_bounds = array<i64: 1, 4>}, {transform_indices = @transform_11, window_bounds = array<i64: 8, 4>}]} {
    %c0 = arith.constant 0 : index
    %c0_0 = arith.constant 0 : index
    %0 = vector.load %arg1[%c0, %c0_0] : memref<8x16xbf16, #tpu.memory_space<vmem>>, vector<8x16xbf16>
    %c0_1 = arith.constant 0 : index
    %c0_2 = arith.constant 0 : index
    %1 = vector.load %arg2[%c0_1, %c0_2] : memref<16x40xbf16, #tpu.memory_space<vmem>>, vector<16x40xbf16>
    %cst = arith.constant dense<0.000000e+00> : vector<8x40xf32>
    %2 = tpu.matmul %0, %1, %cst {dimension_numbers = #tpu.dot_dimension_numbers<[1], [0], [0], [1], [0, 0, 1, 1], [], []>} : vector<8x16xbf16>, vector<16x40xbf16>, vector<8x40xf32> -> vector<8x40xf32>
    %c0_3 = arith.constant 0 : index
    %c0_4 = arith.constant 0 : index
    %3 = vector.load %arg3[%c0_3, %c0_4] : memref<1x40xf32, #tpu.memory_space<vmem>>, vector<1x40xf32>
    %4 = vector.broadcast %3 : vector<1x40xf32> to vector<8x40xf32>
    %5 = arith.addf %2, %4 : vector<8x40xf32>
    %6 = math.tanh %5 : vector<8x40xf32>
    %7 = arith.truncf %6 : vector<8x40xf32> to vector<8x40xbf16>
    %c0_5 = arith.constant 0 : index
    %c0_6 = arith.constant 0 : index
    %8 = vector.load %arg4[%c0_5, %c0_6] : memref<40x40xbf16, #tpu.memory_space<vmem>>, vector<40x40xbf16>
    %cst_7 = arith.constant dense<0.000000e+00> : vector<8x40xf32>
    %9 = tpu.matmul %7, %8, %cst_7 {dimension_numbers = #tpu.dot_dimension_numbers<[1], [0], [0], [1], [0, 0, 1, 1], [], []>} : vector<8x40xbf16>, vector<40x40xbf16>, vector<8x40xf32> -> vector<8x40xf32>
    %c0_8 = arith.constant 0 : index
    %c0_9 = arith.constant 0 : index
    %10 = vector.load %arg5[%c0_8, %c0_9] : memref<1x40xf32, #tpu.memory_space<vmem>>, vector<1x40xf32>
    %11 = vector.broadcast %10 : vector<1x40xf32> to vector<8x40xf32>
    %12 = arith.addf %9, %11 : vector<8x40xf32>
    %13 = math.tanh %12 : vector<8x40xf32>
    %14 = arith.truncf %13 : vector<8x40xf32> to vector<8x40xbf16>
    %c0_10 = arith.constant 0 : index
    %c0_11 = arith.constant 0 : index
    %15 = vector.load %arg6[%c0_10, %c0_11] : memref<40x40xbf16, #tpu.memory_space<vmem>>, vector<40x40xbf16>
    %cst_12 = arith.constant dense<0.000000e+00> : vector<8x40xf32>
    %16 = tpu.matmul %14, %15, %cst_12 {dimension_numbers = #tpu.dot_dimension_numbers<[1], [0], [0], [1], [0, 0, 1, 1], [], []>} : vector<8x40xbf16>, vector<40x40xbf16>, vector<8x40xf32> -> vector<8x40xf32>
    %c0_13 = arith.constant 0 : index
    %c0_14 = arith.constant 0 : index
    %17 = vector.load %arg7[%c0_13, %c0_14] : memref<1x40xf32, #tpu.memory_space<vmem>>, vector<1x40xf32>
    %18 = vector.broadcast %17 : vector<1x40xf32> to vector<8x40xf32>
    %19 = arith.addf %16, %18 : vector<8x40xf32>
    %20 = math.tanh %19 : vector<8x40xf32>
    %21 = arith.truncf %20 : vector<8x40xf32> to vector<8x40xbf16>
    %c0_15 = arith.constant 0 : index
    %c0_16 = arith.constant 0 : index
    %22 = vector.load %arg8[%c0_15, %c0_16] : memref<40x40xbf16, #tpu.memory_space<vmem>>, vector<40x40xbf16>
    %cst_17 = arith.constant dense<0.000000e+00> : vector<8x40xf32>
    %23 = tpu.matmul %21, %22, %cst_17 {dimension_numbers = #tpu.dot_dimension_numbers<[1], [0], [0], [1], [0, 0, 1, 1], [], []>} : vector<8x40xbf16>, vector<40x40xbf16>, vector<8x40xf32> -> vector<8x40xf32>
    %c0_18 = arith.constant 0 : index
    %c0_19 = arith.constant 0 : index
    %24 = vector.load %arg9[%c0_18, %c0_19] : memref<1x40xf32, #tpu.memory_space<vmem>>, vector<1x40xf32>
    %25 = vector.broadcast %24 : vector<1x40xf32> to vector<8x40xf32>
    %26 = arith.addf %23, %25 : vector<8x40xf32>
    %27 = math.tanh %26 : vector<8x40xf32>
    %28 = arith.truncf %27 : vector<8x40xf32> to vector<8x40xbf16>
    %c0_20 = arith.constant 0 : index
    %c0_21 = arith.constant 0 : index
    %29 = vector.load %arg10[%c0_20, %c0_21] : memref<40x4xbf16, #tpu.memory_space<vmem>>, vector<40x4xbf16>
    %cst_22 = arith.constant dense<0.000000e+00> : vector<8x4xf32>
    %30 = tpu.matmul %28, %29, %cst_22 {dimension_numbers = #tpu.dot_dimension_numbers<[1], [0], [0], [1], [0, 0, 1, 1], [], []>} : vector<8x40xbf16>, vector<40x4xbf16>, vector<8x4xf32> -> vector<8x4xf32>
    %c0_23 = arith.constant 0 : index
    %c0_24 = arith.constant 0 : index
    %31 = vector.load %arg11[%c0_23, %c0_24] : memref<1x4xf32, #tpu.memory_space<vmem>>, vector<1x4xf32>
    %32 = vector.broadcast %31 : vector<1x4xf32> to vector<8x4xf32>
    %33 = arith.addf %30, %32 : vector<8x4xf32>
    %c0_25 = arith.constant 0 : index
    %c0_26 = arith.constant 0 : index
    %34 = vector.load %arg12[%c0_25, %c0_26] : memref<8x4xf32, #tpu.memory_space<vmem>>, vector<8x4xf32>
    tpu.vector_store %arg12[%c0_25, %c0_26], %33 {strides = array<i32>} : memref<8x4xf32, #tpu.memory_space<vmem>>, vector<8x4xf32>,
    return
  }
  func.func @transform_0(%arg0: i32) -> (i32, i32) {
    %c0_i32 = arith.constant 0 : i32
    %c0_i32_0 = arith.constant 0 : i32
    return %arg0, %c0_i32 : i32, i32
  }
  func.func @transform_1(%arg0: i32) -> (i32, i32) {
    %c0_i32 = arith.constant 0 : i32
    %c0_i32_0 = arith.constant 0 : i32
    %c0_i32_1 = arith.constant 0 : i32
    return %c0_i32, %c0_i32_0 : i32, i32
  }
  func.func @transform_2(%arg0: i32) -> (i32, i32) {
    %c0_i32 = arith.constant 0 : i32
    %c0_i32_0 = arith.constant 0 : i32
    %c0_i32_1 = arith.constant 0 : i32
    return %c0_i32, %c0_i32_0 : i32, i32
  }
  func.func @transform_3(%arg0: i32) -> (i32, i32) {
    %c0_i32 = arith.constant 0 : i32
    %c0_i32_0 = arith.constant 0 : i32
    %c0_i32_1 = arith.constant 0 : i32
    return %c0_i32, %c0_i32_0 : i32, i32
  }
  func.func @transform_4(%arg0: i32) -> (i32, i32) {
    %c0_i32 = arith.constant 0 : i32
    %c0_i32_0 = arith.constant 0 : i32
    %c0_i32_1 = arith.constant 0 : i32
    return %c0_i32, %c0_i32_0 : i32, i32
  }
  func.func @transform_5(%arg0: i32) -> (i32, i32) {
    %c0_i32 = arith.constant 0 : i32
    %c0_i32_0 = arith.constant 0 : i32
    %c0_i32_1 = arith.constant 0 : i32
    return %c0_i32, %c0_i32_0 : i32, i32
  }
  func.func @transform_6(%arg0: i32) -> (i32, i32) {
    %c0_i32 = arith.constant 0 : i32
    %c0_i32_0 = arith.constant 0 : i32
    %c0_i32_1 = arith.constant 0 : i32
    return %c0_i32, %c0_i32_0 : i32, i32
  }
  func.func @transform_7(%arg0: i32) -> (i32, i32) {
    %c0_i32 = arith.constant 0 : i32
    %c0_i32_0 = arith.constant 0 : i32
    %c0_i32_1 = arith.constant 0 : i32
    return %c0_i32, %c0_i32_0 : i32, i32
  }
  func.func @transform_8(%arg0: i32) -> (i32, i32) {
    %c0_i32 = arith.constant 0 : i32
    %c0_i32_0 = arith.constant 0 : i32
    %c0_i32_1 = arith.constant 0 : i32
    return %c0_i32, %c0_i32_0 : i32, i32
  }
  func.func @transform_9(%arg0: i32) -> (i32, i32) {
    %c0_i32 = arith.constant 0 : i32
    %c0_i32_0 = arith.constant 0 : i32
    %c0_i32_1 = arith.constant 0 : i32
    return %c0_i32, %c0_i32_0 : i32, i32
  }
  func.func @transform_10(%arg0: i32) -> (i32, i32) {
    %c0_i32 = arith.constant 0 : i32
    %c0_i32_0 = arith.constant 0 : i32
    %c0_i32_1 = arith.constant 0 : i32
    return %c0_i32, %c0_i32_0 : i32, i32
  }
  func.func @transform_11(%arg0: i32) -> (i32, i32) {
    %c0_i32 = arith.constant 0 : i32
    %c0_i32_0 = arith.constant 0 : i32
    return %arg0, %c0_i32 : i32, i32
  }
}

</mosaic_0001>

<bundles_post_ra>
// kernel: regression_net_forward.1
= control target key start
LH: loop header
LB: loop body
LE: loop exit
PB: predicated region body
PF: predicated region fallthrough
CT: control target
= control target key end

     0   :  { %v517_v0 = vmov 0.0   ;;  %vm518_vm0 = vmmov 0   ;;  %vm55_vm1 = vcmask 130048   ;;  %vm132_vm2 = vcmask 1043456   ;;  %s670_s1 = inlined_call_operand.vmem [shape: bf16[16,40], index: 1, kind: input, shape index: {}]   ;;  %s671_s0 = inlined_call_operand.vmem [shape: bf16[8,16], index: 0, kind: input, shape index: {}]   ;;  %s672_s3 = inlined_call_operand.vmem [shape: bf16[40,40], index: 3, kind: input, shape index: {}]   ;;  %s673_s2 = inlined_call_operand.vmem [shape: f32[1,40], index: 2, kind: input, shape index: {}]   ;;  %s674_s5 = inlined_call_operand.vmem [shape: bf16[40,40], index: 5, kind: input, shape index: {}]   ;;  %s675_s4 = inlined_call_operand.vmem [shape: f32[1,40], index: 4, kind: input, shape index: {}]   ;;  %s676_s7 = inlined_call_operand.vmem [shape: bf16[40,40], index: 7, kind: input, shape index: {}]   ;;  %s677_s6 = inlined_call_operand.vmem [shape: f32[1,40], index: 6, kind: input, shape index: {}]   ;;  %s678_s9 = inlined_call_operand.vmem [shape: bf16[40,4], index: 9, kind: input, shape index: {}]   ;;  %s679_s8 = inlined_call_operand.vmem [shape: f32[1,40], index: 8, kind: input, shape index: {}]   ;;  %s680_s10 = inlined_call_operand.vmem [shape: f32[1,4], index: 10, kind: input, shape index: {}]   ;;  %s681_s11 = inlined_call_operand.vmem [shape: f32[8,4], index: 11, kind: output, shape index: {}]  }
   0x1   :  { %448 = vmatprep.subr.bf16.mxu0 %v517_v0  ;;  %v496_v1 = vld [vmem:[%s670_s1] sm:$0xff]   ;;  %450 = vmatprep.mubr.msk.bf16.mxu0 %vm518_vm0, %v517_v0  ;;  %v497_v3 = vld [vmem:[%s672_s3 + $0x10] ss:$0 sps:$4 sm:$0xff]   ;;  %v498_v5 = vld [vmem:[%s672_s3 + $0x8] sm:$0xff]   ;;  %vm128_vm3 = vcmask 326656   ;;  %vm401_vm4 = vcmask 31744  }
   0x2   :  { %454 = vmatprep.subr.bf16.mxu1 %v517_v0  ;;  %460 = vmatprep.mubr.msk.bf16.mxu1 %vm518_vm0, %v517_v0  ;;  %v39_v2 = vld [vmem:[%s671_s0] sm:$0xf]  ;;  %v134_v4 = vsel %vm132_vm2, %v497_v3, 0  ;;  %v500_v15 = vld [vmem:[%s674_s5 + $0x10] ss:$0 sps:$4 sm:$0xff]   ;;  %v501_v17 = vld [vmem:[%s674_s5 + $0x8] sm:$0xff]  }
   0x3   :  { %449 = vmatpush3.bf16.msra.mxu0 %v496_v1  ;;  %455 = vmatpush3.bf16.msra.mxu1 %v134_v4  ;;  %v499_v6 = vld [vmem:[%s672_s3] sm:$0xff]   ;;  %v209_v16 = vsel %vm132_vm2, %v500_v15, 0  ;;  %v503_v27 = vld [vmem:[%s676_s7 + $0x10] ss:$0 sps:$4 sm:$0xff]   ;;  %v504_v29 = vld [vmem:[%s676_s7 + $0x8] sm:$0xff]  }
   0x4   :  { %464 = vmatprep.subr.bf16.mxu0 %v517_v0  ;;  %456 = vmatprep.subr.bf16.mxu1 %v517_v0  ;;  %v407_v7 = vld [vmem:[%s673_s2] ss:$0 sm:$0xff]  ;;  %v284_v28 = vsel %vm132_vm2, %v503_v27, 0  ;;  %v506_v39 = vld [vmem:[%s678_s9 + $0x10] ss:$0 sps:$4 sm:$0xff]   ;;  %v507_v41 = vld [vmem:[%s678_s9 + $0x8] sm:$0xff]  }
   0x5   :  { %v502_v18 = vld [vmem:[%s674_s5] sm:$0xff]   ;;  %v359_v40 = vsel %vm132_vm2, %v506_v39, 0 }
   0x6   :  { %451 = vmatmul.mubr.msk.bf16.vlgmr.msra.gmra.mxu0 %vm55_vm1, %v39_v2  ;;  %v410_v19 = vld [vmem:[%s675_s4] ss:$0 sm:$0xff] }
   0x7   :  { %470 = vmatprep.mubr.msk.bf16.mxu0 %vm518_vm0, %v517_v0  ;;  %457 = vmatpush3.bf16.msra.mxu1 %v498_v5  ;;  %v505_v30 = vld [vmem:[%s676_s7] sm:$0xff]  }
   0x8   :  { %458 = vmatprep.subr.bf16.mxu1 %v517_v0  ;;  %465 = vmatpush3.bf16.msra.mxu0 %v209_v16  ;;  %v415_v31 = vld [vmem:[%s677_s6] ss:$0 sm:$0xff] }
   0x9   :  { %466 = vmatprep.subr.bf16.mxu0 %v517_v0  ;;  %v508_v42 = vld [vmem:[%s678_s9] sm:$0xff]  }
   0xa   :  { %v420_v43 = vld [vmem:[%s679_s8] ss:$0 sm:$0xff] }
   0xb   :  { %459 = vmatpush3.bf16.msra.mxu1 %v499_v6  ;;  %v425_v51 = vld [vmem:[%s680_s10] ss:$0 sm:$0xff] }
   0xc   :  { %474 = vmatprep.subr.bf16.mxu1 %v517_v0  ;;  %467 = vmatpush3.bf16.msra.mxu0 %v501_v17 }
   0xd   :  { %468 = vmatprep.subr.bf16.mxu0 %v517_v0 }
  0x10   :  { %469 = vmatpush3.bf16.msra.mxu0 %v502_v18 }
  0x11   :  { %484 = vmatprep.subr.bf16.mxu0 %v517_v0 }
  0xc6   :  { %v93_v8 = vpop.f32.mrf.mxu0 }
  0xc7   :  { %v94_v9 = vadd.f32 %v407_v7, %v93_v8 }
  0xc8   :  { %v452_v10 = vpop.f32.mrf.mxu0 }
  0xc9   :  { %509 = vtanh.f32 %v94_v9 }
  0xca   :  { %v96_v11 = vpop.f32.mrf.mxu0 }
  0xcc   :  { %v453_v12 = vpop.f32.mrf.mxu0 }
  0xd6   :  { %v510_v13 = vpop.eup %509 }
  0xd7   :  { %v100_v14 = vpack.c.bf16 %v510_v13, %v510_v13 }
  0xd9   :  { %461 = vmatmul.mubr.msk.bf16.vlgmr.msra.gmra.mxu1 %vm128_vm3, %v100_v14 }
  0xda   :  { %480 = vmatprep.mubr.msk.bf16.mxu1 %vm518_vm0, %v517_v0  ;;  %475 = vmatpush3.bf16.msra.mxu1 %v284_v28 }
  0xdb   :  { %476 = vmatprep.subr.bf16.mxu1 %v517_v0 }
  0xde   :  { %477 = vmatpush3.bf16.msra.mxu1 %v504_v29 }
  0xdf   :  { %478 = vmatprep.subr.bf16.mxu1 %v517_v0 }
  0xe2   :  { %479 = vmatpush3.bf16.msra.mxu1 %v505_v30 }
 0x199   :  { %v170_v20 = vpop.f32.mrf.mxu1 }
 0x19a   :  { %v171_v21 = vadd.f32 %v410_v19, %v170_v20 }
 0x19b   :  { %v462_v22 = vpop.f32.mrf.mxu1 }
 0x19c   :  { %511 = vtanh.f32 %v171_v21 }
 0x19d   :  { %v173_v23 = vpop.f32.mrf.mxu1 }
 0x19f   :  { %v463_v24 = vpop.f32.mrf.mxu1 }
 0x1a9   :  { %v512_v25 = vpop.eup %511 }
 0x1aa   :  { %v177_v26 = vpack.c.bf16 %v512_v25, %v512_v25 }
 0x1ac   :  { %471 = vmatmul.mubr.msk.bf16.vlgmr.msra.gmra.mxu0 %vm128_vm3, %v177_v26 }
 0x1ad   :  { %490 = vmatprep.mubr.msk.bf16.mxu0 %vm518_vm0, %v517_v0  ;;  %485 = vmatpush3.bf16.msra.mxu0 %v359_v40 }
 0x1ae   :  { %486 = vmatprep.subr.bf16.mxu0 %v517_v0 }
 0x1b1   :  { %487 = vmatpush3.bf16.msra.mxu0 %v507_v41 }
 0x1b2   :  { %488 = vmatprep.subr.bf16.mxu0 %v517_v0 }
 0x1b5   :  { %489 = vmatpush3.bf16.msra.mxu0 %v508_v42 }
 0x26c   :  { %v245_v32 = vpop.f32.mrf.mxu0 }
 0x26d   :  { %v246_v33 = vadd.f32 %v415_v31, %v245_v32 }
 0x26e   :  { %v472_v34 = vpop.f32.mrf.mxu0 }
 0x26f   :  { %513 = vtanh.f32 %v246_v33 }
 0x270   :  { %v248_v35 = vpop.f32.mrf.mxu0 }
 0x272   :  { %v473_v36 = vpop.f32.mrf.mxu0 }
 0x27c   :  { %v514_v37 = vpop.eup %513 }
 0x27d   :  { %v252_v38 = vpack.c.bf16 %v514_v37, %v514_v37 }
 0x27f   :  { %481 = vmatmul.mubr.msk.bf16.vlgmr.msra.gmra.mxu1 %vm128_vm3, %v252_v38 }
 0x33f   :  { %v320_v44 = vpop.f32.mrf.mxu1 }
 0x340   :  { %v321_v45 = vadd.f32 %v420_v43, %v320_v44 }
 0x341   :  { %v482_v46 = vpop.f32.mrf.mxu1 }
 0x342   :  { %515 = vtanh.f32 %v321_v45 }
 0x343   :  { %v323_v47 = vpop.f32.mrf.mxu1 }
 0x345   :  { %v483_v48 = vpop.f32.mrf.mxu1 }
 0x34f   :  { %v516_v49 = vpop.eup %515 }
 0x350   :  { %v327_v50 = vpack.c.bf16 %v516_v49, %v516_v49 }
 0x352   :  { %491 = vmatmul.mubr.msk.bf16.vlgmr.msra.gmra.mxu0 %vm128_vm3, %v327_v50 }
 0x412   :  { %v395_v52 = vpop.f32.mrf.mxu0 }
 0x413   :  { %v396_v53 = vadd.f32 %v425_v51, %v395_v52 }
 0x414   :  { %v492_v54 = vpop.f32.mrf.mxu0 }
 0x415   :  { %402 = vst.msk [vmem:[%s681_s11] sm:$0xff] %vm401_vm4, %v396_v53 }
 0x416   :  { %v398_v55 = vpop.f32.mrf.mxu0 }
 0x418   :  { %v493_v56 = vpop.f32.mrf.mxu0 }

</bundles_post_ra>
